<compile_context>
chip_gen: v5e
topology: v5e:2x2
jax: 0.10.0
libtpu: 0.0.40
codegen_flags: <defaults>
</compile_context>

<pallas_src>
import functools

import jax
import jax.numpy as jnp
from jax.experimental import pallas as pl
from jax.experimental.pallas import tpu as pltpu


_TARGET_BLOCK_BYTES = 4 * 1024 * 1024   # ~4 MiB per input block per grid step
_VMEM_LIMIT_BYTES = 32 * 1024 * 1024    # 2 inputs x 2 buffers x 4 MiB = 16 MiB used

# Whether the CORE_PARALLEL grid-dimension semantic is available / accepted by
# the current jax + chip.  Flipped to False on the first lowering failure.
_CORE_PARALLEL_STATE = {"supported": hasattr(pltpu, "CORE_PARALLEL")}


def _sse_partial_kernel(o_ref, t_ref, out_ref, *, need_mask, valid_last, out_rows):
    """Per-block sum of squared differences, reduced to a lane-dense partial."""
    d = o_ref[...].astype(jnp.float32) - t_ref[...].astype(jnp.float32)
    tr, lane = d.shape

    def reduce_and_store(x):
        sq = x * x
        if out_rows == 8:
            # Free reshape (groups whole vregs); axis-0 sum is pure VALU adds.
            part = sq.reshape(tr // 8, 8, lane).sum(axis=0)
        else:
            part = sq.sum(axis=0, keepdims=True)
        out_ref[...] = part.reshape(out_ref.shape)

    if need_mask:
        last = pl.num_programs(0) - 1

        @pl.when(pl.program_id(0) != last)
        def _():
            reduce_and_store(d)

        @pl.when(pl.program_id(0) == last)
        def _():
            # Only the last block overruns the array; zero the out-of-bounds
            # (undefined) rows before squaring.  (tr, 1) sublane iota only.
            row = jax.lax.broadcasted_iota(jnp.int32, (tr, 1), 0)
            reduce_and_store(jnp.where(row < valid_last, d, 0.0))
    else:
        reduce_and_store(d)


@functools.lru_cache(maxsize=None)
def _build_sse_call(rows, lane, tr, n_blocks, need_mask, valid_last, out_rows,
                    dtype_name, semantics):
    dtype = jnp.dtype(dtype_name)
    itemsize = dtype.itemsize
    n = rows * lane

    if semantics == "core_parallel":
        dim_sem = (getattr(pltpu, "CORE_PARALLEL"),)
    else:
        dim_sem = (semantics,)

    kernel = functools.partial(
        _sse_partial_kernel,
        need_mask=need_mask,
        valid_last=valid_last,
        out_rows=out_rows,
    )

    return pl.pallas_call(
        kernel,
        out_shape=jax.ShapeDtypeStruct((n_blocks, out_rows, lane), jnp.float32),
        grid=(n_blocks,),
        in_specs=[
            pl.BlockSpec((tr, lane), lambda i: (i, 0)),
            pl.BlockSpec((tr, lane), lambda i: (i, 0)),
        ],
        out_specs=pl.BlockSpec((1, out_rows, lane), lambda i: (i, 0, 0)),
        compiler_params=pltpu.CompilerParams(
            dimension_semantics=dim_sem,
            vmem_limit_bytes=_VMEM_LIMIT_BYTES,
        ),
        cost_estimate=pl.CostEstimate(
            flops=3 * n,
            transcendentals=0,
            bytes_accessed=2 * n * itemsize + n_blocks * out_rows * lane * 4,
        ),
    )


def _sse_sum_slab(o2, t2):
    """Sum of squared differences over a lane-dense (rows, lane) slab."""
    rows, lane = o2.shape
    itemsize = jnp.dtype(o2.dtype).itemsize

    tr_target = max(8, (_TARGET_BLOCK_BYTES // (lane * itemsize)) // 8 * 8)
    if tr_target >= rows:
        tr, n_blocks, need_mask = rows, 1, False
    else:
        # Divisor-friendly block: evenly sized blocks, usually no masking.
        n_blocks = pl.cdiv(rows, tr_target)
        tr = ((pl.cdiv(rows, n_blocks) + 7) // 8) * 8
        n_blocks = pl.cdiv(rows, tr)
        need_mask = (n_blocks * tr != rows)
    valid_last = rows - (n_blocks - 1) * tr
    out_rows = 8 if (tr % 8 == 0) else 1
    dtype_name = jnp.dtype(o2.dtype).name

    if n_blocks > 1 and _CORE_PARALLEL_STATE["supported"]:
        semantics = "core_parallel"
    elif n_blocks > 1:
        semantics = "parallel"
    else:
        semantics = "arbitrary"

    try:
        call = _build_sse_call(rows, lane, tr, n_blocks, need_mask, valid_last,
                               out_rows, dtype_name, semantics)
        partials = call(o2, t2)
    except Exception:
        if semantics != "core_parallel":
            raise
        # CORE_PARALLEL not supported on this chip/jax: fall back once,
        # remember for subsequent calls.
        _CORE_PARALLEL_STATE["supported"] = False
        call = _build_sse_call(rows, lane, tr, n_blocks, need_mask, valid_last,
                               out_rows, dtype_name, "parallel")
        partials = call(o2, t2)

    return jnp.sum(partials)


def center_loss(outputs, targets):
    """Pallas TPU implementation of WS-DAN CenterLoss forward."""
    assert outputs.shape == targets.shape, "outputs/targets must match shape"
    batch = outputs.shape[0]
    n = outputs.size

    lane = None
    for c in (512, 256, 128):
        if n % c == 0:
            lane = c
            break

    if lane is not None:
        # Free reshape into a lane-dense slab; whole array handled in-kernel.
        sse = _sse_sum_slab(outputs.reshape(n // lane, lane),
                            targets.reshape(n // lane, lane))
    else:
        # Ragged element count: 512-aligned prefix through the fast slab
        # kernel, <512-element tail in plain jnp (negligible).
        o_flat = outputs.reshape(-1)
        t_flat = targets.reshape(-1)
        prefix = (n // 512) * 512
        if prefix >= 512:
            sse = _sse_sum_slab(o_flat[:prefix].reshape(prefix // 512, 512),
                                t_flat[:prefix].reshape(prefix // 512, 512))
            tail = (o_flat[prefix:] - t_flat[prefix:]).astype(jnp.float32)
            sse = sse + jnp.sum(tail * tail)
        else:
            d = (o_flat - t_flat).astype(jnp.float32)
            sse = jnp.sum(d * d)

    return sse / jnp.float32(batch)


def _reference(outputs, targets):
    return jnp.sum((outputs.astype(jnp.float32) - targets.astype(jnp.float32)) ** 2) \
        / outputs.shape[0]


if __name__ == "__main__":
    key = jax.random.PRNGKey(0)
    ks = jax.random.split(key, 10)

    def check(shape, k_a, k_b, rtol=2e-4, atol=1e-5):
        o = jax.random.normal(k_a, shape, dtype=jnp.float32)
        t = jax.random.normal(k_b, shape, dtype=jnp.float32)
        got = jax.block_until_ready(center_loss(o, t))
        ref = _reference(o, t)
        assert jnp.allclose(got, ref, rtol=rtol, atol=atol), (shape, got, ref)

    # Primary small NCHW-like case (matches the module's typical use).
    check((2, 4, 16, 16), ks[0], ks[1])
    # Multi-block, evenly divisible -> no masking; exercises CORE_PARALLEL path.
    check((2, 32, 224, 224), ks[2], ks[3])
    # Multi-block ragged rows -> last-block-only mask via pl.when.
    check((3, 7, 224, 224), ks[4], ks[5])
    # Element count not a multiple of 128 -> 512-aligned prefix + jnp tail.
    check((2, 5, 67), ks[6], ks[7])
    # Tiny (< 512 elements) -> pure jnp path.
    check((2, 5, 13), ks[8], ks[9])

    print("KERNEL_OK")
</pallas_src>

<mosaic_0001>
module attributes {stable_mosaic.version = 11 : i64} {
  func.func @_sse_partial_kernel(%arg0: i32, %arg1: memref<4x512xf32, #tpu.memory_space<vmem>>, %arg2: memref<4x512xf32, #tpu.memory_space<vmem>>, %arg3: memref<1x1x512xf32, #tpu.memory_space<vmem>>) attributes {dimension_semantics = [#tpu.dimension_semantics<arbitrary>], iteration_bounds = array<i64: 1>, scalar_prefetch = 0 : i64, scratch_operands = 0 : i64, tpu.core_type = #tpu.core_type<tc>, window_params = [{transform_indices = @transform_0, window_bounds = array<i64: 4, 512>}, {transform_indices = @transform_1, window_bounds = array<i64: 4, 512>}, {transform_indices = @transform_2, window_bounds = array<i64: 1, 1, 512>}]} {
    %c0 = arith.constant 0 : index
    %c0_0 = arith.constant 0 : index
    %0 = vector.load %arg1[%c0, %c0_0] : memref<4x512xf32, #tpu.memory_space<vmem>>, vector<4x512xf32>
    %c0_1 = arith.constant 0 : index
    %c0_2 = arith.constant 0 : index
    %1 = vector.load %arg2[%c0_1, %c0_2] : memref<4x512xf32, #tpu.memory_space<vmem>>, vector<4x512xf32>
    %2 = arith.subf %0, %1 : vector<4x512xf32>
    %3 = arith.mulf %2, %2 : vector<4x512xf32>
    %cst = arith.constant dense<0.000000e+00> : vector<512xf32>
    %4 = vector.multi_reduction <add>, %3, %cst [0] : vector<4x512xf32> to vector<512xf32>
    %5 = vector.shape_cast %4 : vector<512xf32> to vector<1x512xf32>
    %6 = vector.shape_cast %5 : vector<1x512xf32> to vector<1x1x512xf32>
    %c0_3 = arith.constant 0 : index
    %c0_4 = arith.constant 0 : index
    %c0_5 = arith.constant 0 : index
    %7 = vector.load %arg3[%c0_3, %c0_4, %c0_5] : memref<1x1x512xf32, #tpu.memory_space<vmem>>, vector<1x1x512xf32>
    tpu.vector_store %arg3[%c0_3, %c0_4, %c0_5], %6 {strides = array<i32>} : memref<1x1x512xf32, #tpu.memory_space<vmem>>, vector<1x1x512xf32>,
    return
  }
  func.func @transform_0(%arg0: i32) -> (i32, i32) {
    %c0_i32 = arith.constant 0 : i32
    %c0_i32_0 = arith.constant 0 : i32
    return %arg0, %c0_i32 : i32, i32
  }
  func.func @transform_1(%arg0: i32) -> (i32, i32) {
    %c0_i32 = arith.constant 0 : i32
    %c0_i32_0 = arith.constant 0 : i32
    return %arg0, %c0_i32 : i32, i32
  }
  func.func @transform_2(%arg0: i32) -> (i32, i32, i32) {
    %c0_i32 = arith.constant 0 : i32
    %c0_i32_0 = arith.constant 0 : i32
    %c0_i32_1 = arith.constant 0 : i32
    return %arg0, %c0_i32, %c0_i32_0 : i32, i32, i32
  }
}

</mosaic_0001>

<bundles_post_ra>
// kernel: tpu_custom_call.1
= control target key start
LH: loop header
LB: loop body
LE: loop exit
PB: predicated region body
PF: predicated region fallthrough
CT: control target
= control target key end

     0   :  { %7 = vsyncpa [#allocation3], 0  ;;  %s235_s0 = inlined_call_operand.hbm [shape: f32[4,512], index: 0, kind: input, shape index: {}]   ;;  %s236_s1 = inlined_call_operand.hbm [shape: f32[4,512], index: 1, kind: input, shape index: {}]   ;;  %s237_s2 = inlined_call_operand.hbm [shape: f32[1,1,512], index: 2, kind: output, shape index: {}]  }
   0x1   :  { %8 = vsyncpa [#allocation6], 0 }
   0x2   :  { %9 = vsyncpa [#allocation4], 0  ;;  %s15_s11 = sshll.u32 %s235_s0, 4  ;;  %s208_s12 = smov [#allocation2]   ;;  %s16_s11 = int_to_ptr.hbm [resolvable:$true] %s15_s11 }
   0x3   :  { %s17_s13 = sshll.u32 %s208_s12, 4  ;;  %s26_s16 = sshll.u32 %s236_s1, 4  ;;  %s18_s13 = int_to_ptr.vmem [resolvable:$true] %s17_s13  ;;  %s27_s16 = int_to_ptr.hbm [resolvable:$true] %s26_s16 }
   0x4   :  { %20 = dma.hbm_to_vmem [thread:$0]  %s16_s11, 256, %s18_s13, [#allocation3]  }
   0x5   :  { %s209_s17 = smov [#allocation5]  }
   0x6   :  { %s28_s18 = sshll.u32 %s209_s17, 4  ;;  %s29_s18 = int_to_ptr.vmem [resolvable:$true] %s28_s18 }
   0x7   :  { %31 = dma.hbm_to_vmem [thread:$0]  %s27_s16, 256, %s29_s18, [#allocation6]  }
   0x8   :  { %202 = dma.done.wait [#allocation3], 256  }
   0x9   :  { %203 = vsyncadd [#allocation3], 4294967040 }
   0xa   :  { %204 = dma.done.wait [#allocation6], 256  }
   0xb   :  { %205 = vsyncadd [#allocation6], 4294967040  ;;  %v40_v0 = vld [vmem:[#allocation2] sm:$0xff]  ;;  %v42_v1 = vld [vmem:[#allocation5] sm:$0xff]  ;;  %vm61_vm0 = vcmask 1043456   ;;  %v104_v36 = vlaneseq  ;;  %vm97_vm1 = vcmask 1040384  }
   0xc   :  { %v41_v2 = vld [vmem:[#allocation2 + $0x8] sm:$0xff]  ;;  %v44_v3 = vsub.f32 %v40_v0, %v42_v1  ;;  %v43_v4 = vld [vmem:[#allocation5 + $0x8] sm:$0xff]  ;;  %vm99_vm2 = vcmask 1042434   ;;  %vm101_vm3 = vcmask 1041408   ;;  %s210_s0 = smov [#allocation7]   ;;  %s116_s21 = sshll.u32 %s237_s2, 4  ;;  %s117_s21 = int_to_ptr.hbm [resolvable:$true] %s116_s21 }
   0xd   :  { %v45_v5 = vsub.f32 %v41_v2, %v43_v4  ;;  %s114_s1 = sshll.u32 %s210_s0, 4  ;;  %vm106_vm4 = vcmp.lt.s32.totalorder %v104_v36, 512  ;;  %s115_s1 = int_to_ptr.vmem [resolvable:$true] %s114_s1 }
   0xe   :  { %v46_v6 = vmul.f32 %v44_v3, %v44_v3 }
   0xf   :  { %v47_v7 = vmul.f32 %v45_v5, %v45_v5 }
  0x10   :  { %50 = vst [vmem:[#allocation1] ss:$2 sm:$0xff] %v46_v6 }
  0x11   :  { %52 = vst [vmem:[#allocation1 + $0x10] ss:$2 sm:$0xff] %v47_v7 }
  0x17   :  { %v53_v8 = vld.sshfl [vmem:[#allocation1] sm:$0xff pattern:$0x75316420]  ;;  %v54_v9 = vld.sshfl [vmem:[#allocation1 + $0x8] sm:$0xff pattern:$0x75316420] }
  0x18   :  { %v55_v10 = vld.sshfl [vmem:[#allocation1 + $0x10] sm:$0xff pattern:$0x75316420]  ;;  %v56_v11 = vld.sshfl [vmem:[#allocation1 + $0x18] sm:$0xff pattern:$0x75316420] }
  0x19   :  { %v62_v12 = vsel %vm61_vm0, %v53_v8, 0.0  ;;  %v69_v13 = vsel %vm61_vm0, %v54_v9, 0.0  ;;  %v76_v14 = vsel %vm61_vm0, %v55_v10, 0.0  ;;  %v83_v15 = vsel %vm61_vm0, %v56_v11, 0.0 }
  0x1a   :  { %v63_v16 = vrot.slane %v62_v12, 4  ;;  %v70_v17 = vrot.slane %v69_v13, 4  ;;  %v77_v18 = vrot.slane %v76_v14, 4  ;;  %v84_v19 = vrot.slane %v83_v15, 4 }
  0x1c   :  { %v64_v20 = vadd.f32 %v63_v16, %v62_v12  ;;  %v71_v21 = vadd.f32 %v70_v17, %v69_v13  ;;  %v78_v22 = vadd.f32 %v77_v18, %v76_v14  ;;  %v85_v23 = vadd.f32 %v84_v19, %v83_v15 }
  0x1e   :  { %v65_v24 = vrot.slane %v64_v20, 2  ;;  %v72_v25 = vrot.slane %v71_v21, 2  ;;  %v79_v26 = vrot.slane %v78_v22, 2  ;;  %v86_v27 = vrot.slane %v85_v23, 2 }
  0x20   :  { %v66_v28 = vadd.f32 %v65_v24, %v64_v20  ;;  %v73_v29 = vadd.f32 %v72_v25, %v71_v21  ;;  %v80_v30 = vadd.f32 %v79_v26, %v78_v22  ;;  %v87_v31 = vadd.f32 %v86_v27, %v85_v23 }
  0x22   :  { %v67_v32 = vrot.slane %v66_v28, 1  ;;  %v74_v33 = vrot.slane %v73_v29, 1  ;;  %v81_v34 = vrot.slane %v80_v30, 1  ;;  %v88_v35 = vrot.slane %v87_v31, 1 }
  0x24   :  { %v75_v37 = vadd.f32 %v74_v33, %v73_v29  ;;  %v82_v38 = vadd.f32 %v81_v34, %v80_v30  ;;  %v89_v39 = vadd.f32 %v88_v35, %v87_v31  ;;  %v68_v40 = vadd.f32 %v67_v32, %v66_v28 }
  0x26   :  { %v94_v41 = vrot.slane %v75_v37, 7  ;;  %v95_v42 = vrot.slane %v82_v38, 6  ;;  %v96_v43 = vrot.slane %v89_v39, 5 }
  0x28   :  { %v98_v44 = vsel %vm97_vm1, %v68_v40, %v94_v41  ;;  %v100_v45 = vsel %vm99_vm2, %v95_v42, %v96_v43 }
  0x29   :  { %v102_v46 = vsel %vm101_vm3, %v98_v44, %v100_v45 }
  0x2a   :  { %108 = vst.msk [vmem:[#allocation7] sm:$0xf] %vm106_vm4, %v102_v46 }
  0x2b   :  { %119 = dma.vmem_to_hbm [thread:$0]  %s115_s1, 64, %s117_s21, [#allocation4]  }
  0x2c   :  { %206 = dma.done.wait [#allocation4], 64  }
  0x2d   :  { %207 = vsyncadd [#allocation4], 4294967232 }
  0x2e   :  { %124 = vsyncpa [#allocation3], 1 }
  0x2f   :  { %125 = vsyncpa [#allocation6], 1 }
  0x30   :  { %126 = vsyncpa [#allocation4], 1 }

</bundles_post_ra>
